<compile_context>
chip_gen: v7x
topology: tpu7x:2x2x1
jax: 0.10.0
libtpu: 0.0.40
codegen_flags: <defaults>
</compile_context>

<pallas_src>
import jax
import jax.numpy as jnp
from jax import lax
from jax.experimental import pallas as pl
from jax.experimental.pallas import tpu as pltpu

_NEG_BIG = -1e30  # bias for padded softmax columns -> exp() underflows to 0


def _round_up(x, m):
    return (x + m - 1) // m * m


def nb_decoder_kernel(z_ref,
                      w1_ref, b1_ref,
                      w2_ref, b2_ref,
                      w3_ref, b3_ref,
                      ws_ref, bs_ref,
                      scale_ref,
                      h_ref, m_ref, linv_ref):
    """Grid = (batch tiles, gene tiles).

    ws_ref: (n_gene_tiles, h3, tile_n) resident bf16 output weight.
    bs_ref: (n_gene_tiles, 1, tile_n) f32 output bias (padded cols = -1e30).
    Scratch: h_ref (batch_tile, h3), m_ref / linv_ref (batch_tile, 1) f32.
    """
    j = pl.program_id(1)
    n_gene_tiles = ws_ref.shape[0]
    cdt = w1_ref.dtype  # MXU input dtype (bf16 by default)

    @pl.when(j == 0)
    def _():
        # fc1 -> fc2 -> fc3 with ReLU, once per batch tile (f32 accumulate).
        h = jnp.dot(z_ref[...], w1_ref[...], preferred_element_type=jnp.float32)
        h = jnp.maximum(h + b1_ref[...], 0.0)
        h = jnp.dot(h.astype(cdt), w2_ref[...], preferred_element_type=jnp.float32)
        h = jnp.maximum(h + b2_ref[...], 0.0)
        h = jnp.dot(h.astype(cdt), w3_ref[...], preferred_element_type=jnp.float32)
        h = jnp.maximum(h + b3_ref[...], 0.0)
        hv = h.astype(cdt)
        h_ref[...] = hv                      # cache for the per-gene-tile pass

        # Pass 1: online row max / exp-sum over all gene tiles (no stores).
        bt = hv.shape[0]

        def stats_step(t, carry):
            m, l = carry
            logits = jnp.dot(hv, ws_ref[t], preferred_element_type=jnp.float32)
            logits = logits + bs_ref[t]
            m_new = jnp.maximum(m, jnp.max(logits, axis=-1, keepdims=True))
            l = l * jnp.exp(m - m_new) + jnp.sum(jnp.exp(logits - m_new),
                                                 axis=-1, keepdims=True)
            return m_new, l

        m0 = jnp.full((bt, 1), -jnp.inf, dtype=jnp.float32)
        l0 = jnp.zeros((bt, 1), dtype=jnp.float32)
        m, l = lax.fori_loop(0, n_gene_tiles, stats_step, (m0, l0))

        m_ref[...] = m
        r = pl.reciprocal(l, approx=True)    # EUP vrcp -> VALU slot stays free
        r = r * (2.0 - l * r)                # one Newton step -> ~f32 accuracy
        linv_ref[...] = r

    # Pass 2 (every gene tile): recompute this tile's logits, normalize, store.
    logits = jnp.dot(h_ref[...], ws_ref[j], preferred_element_type=jnp.float32)
    logits = logits + bs_ref[j]
    e = jnp.exp(logits - m_ref[...])
    scale_ref[...] = (e * linv_ref[...]).astype(scale_ref.dtype)


def nb_decoder_forward(z, params, *, batch_tile=256, gene_tile=1024,
                       weight_dtype=jnp.bfloat16, scale_dtype=jnp.float32):
    """Fused NBDecoder forward.

    params follows PyTorch conventions: w* are (out, in), b* are (out,),
    log_theta is (n_input,).  Returns (scale (B, n_input), theta (n_input,) f32).
    """
    B, z_dim = z.shape
    h1 = params["w1"].shape[0]
    h2 = params["w2"].shape[0]
    h3 = params["w3"].shape[0]
    n_input = params["ws"].shape[0]

    assert batch_tile % 16 == 0, "batch_tile must be a multiple of 16 (bf16 sublane packing)"
    assert gene_tile % 128 == 0, "gene_tile must be a multiple of 128 (lanes)"

    # theta is batch-independent: compute outside the kernel (exact f32).
    theta = jnp.exp(params["log_theta"].astype(jnp.float32))

    # Hidden-layer weights -> (in, out), cast to bf16 for the MXU; biases f32.
    w1 = params["w1"].T.astype(weight_dtype)
    w2 = params["w2"].T.astype(weight_dtype)
    w3 = params["w3"].T.astype(weight_dtype)
    b1 = params["b1"].reshape(1, h1).astype(jnp.float32)
    b2 = params["b2"].reshape(1, h2).astype(jnp.float32)
    b3 = params["b3"].reshape(1, h3).astype(jnp.float32)

    # Gene tiling: pad genes to a lane-dense multiple of the gene tile; padded
    # columns get a huge negative bias so they vanish under the softmax.
    tile_n = min(gene_tile, _round_up(n_input, 128))
    n_cols = _round_up(n_input, tile_n)
    n_gtiles = n_cols // tile_n

    ws = params["ws"].T.astype(weight_dtype)     # (h3, n_input)
    bs = params["bs"].astype(jnp.float32)        # (n_input,)
    if n_cols != n_input:
        ws = jnp.pad(ws, ((0, 0), (0, n_cols - n_input)))
        bs = jnp.pad(bs, ((0, n_cols - n_input),), constant_values=_NEG_BIG)
    # Leading tile axis so the kernel slices ws/bs on the cheap major dim.
    ws3 = ws.reshape(h3, n_gtiles, tile_n).transpose(1, 0, 2)  # (ng, h3, tn)
    bs3 = bs.reshape(n_gtiles, 1, tile_n)

    # Batch tiling: shrink the tile for tiny batches, pad to a tile multiple.
    bt = min(batch_tile, _round_up(B, 16))
    b_padded = _round_up(B, bt)
    zp = z if b_padded == B else jnp.pad(z, ((0, b_padded - B), (0, 0)))
    zp = zp.astype(weight_dtype)

    grid = (b_padded // bt, n_gtiles)

    # Advisory cost estimate (output matmul counted twice: stats + store pass).
    wsize = jnp.dtype(weight_dtype).itemsize
    osize = jnp.dtype(scale_dtype).itemsize
    flops = 2 * b_padded * (z_dim * h1 + h1 * h2 + h2 * h3 + 2 * h3 * n_cols)
    transcendentals = 2 * b_padded * n_cols
    bytes_accessed = (b_padded * z_dim * wsize
                      + (z_dim * h1 + h1 * h2 + h2 * h3 + h3 * n_cols) * wsize
                      + (h1 + h2 + h3 + n_cols) * 4
                      + b_padded * n_cols * osize)

    const2 = lambda i, j: (0, 0)
    const3 = lambda i, j: (0, 0, 0)

    scale_p = pl.pallas_call(
        nb_decoder_kernel,
        out_shape=jax.ShapeDtypeStruct((b_padded, n_cols), scale_dtype),
        grid_spec=pltpu.PrefetchScalarGridSpec(
            num_scalar_prefetch=0,
            grid=grid,
            in_specs=[
                pl.BlockSpec((bt, z_dim), lambda i, j: (i, 0)),            # z
                pl.BlockSpec((z_dim, h1), const2), pl.BlockSpec((1, h1), const2),
                pl.BlockSpec((h1, h2), const2),    pl.BlockSpec((1, h2), const2),
                pl.BlockSpec((h2, h3), const2),    pl.BlockSpec((1, h3), const2),
                pl.BlockSpec((n_gtiles, h3, tile_n), const3),              # ws (resident)
                pl.BlockSpec((n_gtiles, 1, tile_n), const3),               # bs (resident)
            ],
            out_specs=pl.BlockSpec((bt, tile_n), lambda i, j: (i, j)),
            scratch_shapes=[
                pltpu.VMEM((bt, h3), weight_dtype),   # cached hidden activation
                pltpu.VMEM((bt, 1), jnp.float32),     # softmax row max
                pltpu.VMEM((bt, 1), jnp.float32),     # 1 / exp-sum
            ],
        ),
        compiler_params=pltpu.CompilerParams(
            # Batch tiles are independent ("parallel" -> both TCs on v7x);
            # gene tiles carry scratch state and must stay in order.
            dimension_semantics=("parallel", "arbitrary"),
            # ~15 MiB working set at real scVI scale; 48 MiB leaves headroom
            # below v7x's 64 MiB physical VMEM and is generous for v5e/v6e.
            vmem_limit_bytes=48 * 1024 * 1024,
        ),
        cost_estimate=pl.CostEstimate(flops=flops,
                                      transcendentals=transcendentals,
                                      bytes_accessed=bytes_accessed),
    )(zp, w1, b1, w2, b2, w3, b3, ws3, bs3)

    scale = scale_p[:B, :n_input]
    return scale, theta


def init_params(key, z_dim, h1, h2, h3, n_input):
    ks = jax.random.split(key, 9)

    def linear(kw, kb, fan_in, fan_out):
        # deterministic init mimicking nn.Linear's uniform(-1/sqrt(fan_in), +)
        bound = 1.0 / jnp.sqrt(fan_in)
        w = jax.random.uniform(kw, (fan_out, fan_in), jnp.float32, -bound, bound)
        b = jax.random.uniform(kb, (fan_out,), jnp.float32, -bound, bound)
        return w, b

    w1, b1 = linear(ks[0], ks[1], z_dim, h1)
    w2, b2 = linear(ks[2], ks[3], h1, h2)
    w3, b3 = linear(ks[4], ks[5], h2, h3)
    ws, bs = linear(ks[6], ks[7], h3, n_input)
    log_theta = jax.random.normal(ks[8], (n_input,), jnp.float32)
    return dict(w1=w1, b1=b1, w2=w2, b2=b2, w3=w3, b3=b3,
                ws=ws, bs=bs, log_theta=log_theta)


def reference_forward(z, p):
    def lin(x, w, b):
        return x @ w.T + b
    h = jax.nn.relu(lin(z, p["w1"], p["b1"]))
    h = jax.nn.relu(lin(h, p["w2"], p["b2"]))
    h = jax.nn.relu(lin(h, p["w3"], p["b3"]))
    scale = jax.nn.softmax(lin(h, p["ws"], p["bs"]), axis=-1)
    theta = jnp.exp(p["log_theta"])
    return scale, theta


if __name__ == "__main__":
    key = jax.random.PRNGKey(0)
    k_z, k_p = jax.random.split(key)

    B, z_dim = 8, 8
    h1, h2, h3, n_input = 32, 32, 32, 16

    z = jax.random.normal(k_z, (B, z_dim), jnp.float32)
    params = init_params(k_p, z_dim, h1, h2, h3, n_input)

    scale, theta = nb_decoder_forward(z, params)
    scale, theta = jax.block_until_ready((scale, theta))

    scale_ref, theta_ref = reference_forward(z, params)
    assert scale.shape == (B, n_input) and theta.shape == (n_input,)
    # bf16 weights/activations -> relaxed tolerance vs. the f32 reference.
    assert jnp.allclose(scale, scale_ref, atol=2e-2, rtol=2e-2)
    assert jnp.allclose(theta, theta_ref, atol=1e-5, rtol=1e-5)
    assert jnp.allclose(jnp.sum(scale, axis=-1), 1.0, atol=1e-3)

    print("KERNEL_OK")
</pallas_src>

<mosaic_0001>
module attributes {stable_mosaic.version = 11 : i64} {
  func.func @nb_decoder_kernel(%arg0: i32, %arg1: i32, %arg2: memref<16x8xbf16, #tpu.memory_space<vmem>>, %arg3: memref<8x32xbf16, #tpu.memory_space<vmem>>, %arg4: memref<1x32xf32, #tpu.memory_space<vmem>>, %arg5: memref<32x32xbf16, #tpu.memory_space<vmem>>, %arg6: memref<1x32xf32, #tpu.memory_space<vmem>>, %arg7: memref<32x32xbf16, #tpu.memory_space<vmem>>, %arg8: memref<1x32xf32, #tpu.memory_space<vmem>>, %arg9: memref<1x32x128xbf16, #tpu.memory_space<vmem>>, %arg10: memref<1x1x128xf32, #tpu.memory_space<vmem>>, %arg11: memref<16x128xf32, #tpu.memory_space<vmem>>, %arg12: memref<16x32xbf16, #tpu.memory_space<vmem>>, %arg13: memref<16x1xf32, #tpu.memory_space<vmem>>, %arg14: memref<16x1xf32, #tpu.memory_space<vmem>>) attributes {dimension_semantics = [#tpu.dimension_semantics<parallel>, #tpu.dimension_semantics<arbitrary>], iteration_bounds = array<i64: 1, 1>, scalar_prefetch = 0 : i64, scratch_operands = 3 : i64, tpu.core_type = #tpu.core_type<tc>, window_params = [{transform_indices = @transform_0, window_bounds = array<i64: 16, 8>}, {pipeline_mode = #tpu.pipeline_mode<synchronous>, transform_indices = @transform_1, window_bounds = array<i64: 8, 32>}, {pipeline_mode = #tpu.pipeline_mode<synchronous>, transform_indices = @transform_2, window_bounds = array<i64: 1, 32>}, {pipeline_mode = #tpu.pipeline_mode<synchronous>, transform_indices = @transform_3, window_bounds = array<i64: 32, 32>}, {pipeline_mode = #tpu.pipeline_mode<synchronous>, transform_indices = @transform_4, window_bounds = array<i64: 1, 32>}, {pipeline_mode = #tpu.pipeline_mode<synchronous>, transform_indices = @transform_5, window_bounds = array<i64: 32, 32>}, {pipeline_mode = #tpu.pipeline_mode<synchronous>, transform_indices = @transform_6, window_bounds = array<i64: 1, 32>}, {pipeline_mode = #tpu.pipeline_mode<synchronous>, transform_indices = @transform_7, window_bounds = array<i64: 1, 32, 128>}, {pipeline_mode = #tpu.pipeline_mode<synchronous>, transform_indices = @transform_8, window_bounds = array<i64: 1, 1, 128>}, {transform_indices = @transform_9, window_bounds = array<i64: 16, 128>}]} {
    %c0_i32 = arith.constant 0 : i32
    %0 = arith.cmpi eq, %arg1, %c0_i32 : i32
    %1 = arith.extui %0 : i1 to i32
    %c0_i32_0 = arith.constant 0 : i32
    %2 = arith.cmpi ne, %1, %c0_i32_0 : i32
    scf.if %2 {
      %c0_12 = arith.constant 0 : index
      %c0_13 = arith.constant 0 : index
      %21 = vector.load %arg2[%c0_12, %c0_13] : memref<16x8xbf16, #tpu.memory_space<vmem>>, vector<16x8xbf16>
      %c0_14 = arith.constant 0 : index
      %c0_15 = arith.constant 0 : index
      %22 = vector.load %arg3[%c0_14, %c0_15] : memref<8x32xbf16, #tpu.memory_space<vmem>>, vector<8x32xbf16>
      %cst_16 = arith.constant dense<0.000000e+00> : vector<16x32xf32>
      %23 = tpu.matmul %21, %22, %cst_16 {dimension_numbers = #tpu.dot_dimension_numbers<[1], [0], [0], [1], [0, 0, 1, 1], [], []>} : vector<16x8xbf16>, vector<8x32xbf16>, vector<16x32xf32> -> vector<16x32xf32>
      %c0_17 = arith.constant 0 : index
      %c0_18 = arith.constant 0 : index
      %24 = vector.load %arg4[%c0_17, %c0_18] : memref<1x32xf32, #tpu.memory_space<vmem>>, vector<1x32xf32>
      %25 = vector.broadcast %24 : vector<1x32xf32> to vector<16x32xf32>
      %26 = arith.addf %23, %25 : vector<16x32xf32>
      %cst_19 = arith.constant 0.000000e+00 : f32
      %27 = vector.broadcast %cst_19 : f32 to vector<16x32xf32>
      %28 = arith.maximumf %26, %27 : vector<16x32xf32>
      %29 = arith.truncf %28 : vector<16x32xf32> to vector<16x32xbf16>
      %c0_20 = arith.constant 0 : index
      %c0_21 = arith.constant 0 : index
      %30 = vector.load %arg5[%c0_20, %c0_21] : memref<32x32xbf16, #tpu.memory_space<vmem>>, vector<32x32xbf16>
      %cst_22 = arith.constant dense<0.000000e+00> : vector<16x32xf32>
      %31 = tpu.matmul %29, %30, %cst_22 {dimension_numbers = #tpu.dot_dimension_numbers<[1], [0], [0], [1], [0, 0, 1, 1], [], []>} : vector<16x32xbf16>, vector<32x32xbf16>, vector<16x32xf32> -> vector<16x32xf32>
      %c0_23 = arith.constant 0 : index
      %c0_24 = arith.constant 0 : index
      %32 = vector.load %arg6[%c0_23, %c0_24] : memref<1x32xf32, #tpu.memory_space<vmem>>, vector<1x32xf32>
      %33 = vector.broadcast %32 : vector<1x32xf32> to vector<16x32xf32>
      %34 = arith.addf %31, %33 : vector<16x32xf32>
      %cst_25 = arith.constant 0.000000e+00 : f32
      %35 = vector.broadcast %cst_25 : f32 to vector<16x32xf32>
      %36 = arith.maximumf %34, %35 : vector<16x32xf32>
      %37 = arith.truncf %36 : vector<16x32xf32> to vector<16x32xbf16>
      %c0_26 = arith.constant 0 : index
      %c0_27 = arith.constant 0 : index
      %38 = vector.load %arg7[%c0_26, %c0_27] : memref<32x32xbf16, #tpu.memory_space<vmem>>, vector<32x32xbf16>
      %cst_28 = arith.constant dense<0.000000e+00> : vector<16x32xf32>
      %39 = tpu.matmul %37, %38, %cst_28 {dimension_numbers = #tpu.dot_dimension_numbers<[1], [0], [0], [1], [0, 0, 1, 1], [], []>} : vector<16x32xbf16>, vector<32x32xbf16>, vector<16x32xf32> -> vector<16x32xf32>
      %c0_29 = arith.constant 0 : index
      %c0_30 = arith.constant 0 : index
      %40 = vector.load %arg8[%c0_29, %c0_30] : memref<1x32xf32, #tpu.memory_space<vmem>>, vector<1x32xf32>
      %41 = vector.broadcast %40 : vector<1x32xf32> to vector<16x32xf32>
      %42 = arith.addf %39, %41 : vector<16x32xf32>
      %cst_31 = arith.constant 0.000000e+00 : f32
      %43 = vector.broadcast %cst_31 : f32 to vector<16x32xf32>
      %44 = arith.maximumf %42, %43 : vector<16x32xf32>
      %45 = arith.truncf %44 : vector<16x32xf32> to vector<16x32xbf16>
      %c0_32 = arith.constant 0 : index
      %c0_33 = arith.constant 0 : index
      %46 = vector.load %arg12[%c0_32, %c0_33] : memref<16x32xbf16, #tpu.memory_space<vmem>>, vector<16x32xbf16>
      tpu.vector_store %arg12[%c0_32, %c0_33], %45 {strides = array<i32>} : memref<16x32xbf16, #tpu.memory_space<vmem>>, vector<16x32xbf16>,
      %cst_34 = arith.constant 0xFF800000 : f32
      %47 = vector.broadcast %cst_34 : f32 to vector<16x1xf32>
      %cst_35 = arith.constant 0.000000e+00 : f32
      %48 = vector.broadcast %cst_35 : f32 to vector<16x1xf32>
      %c0_i32_36 = arith.constant 0 : i32
      %49 = arith.index_cast %c0_i32_36 : i32 to index
      %c0_37 = arith.constant 0 : index
      %c0_38 = arith.constant 0 : index
      %50 = vector.load %arg9[%49, %c0_37, %c0_38] : memref<1x32x128xbf16, #tpu.memory_space<vmem>>, vector<1x32x128xbf16>
      %51 = vector.shape_cast %50 : vector<1x32x128xbf16> to vector<32x128xbf16>
      %cst_39 = arith.constant dense<0.000000e+00> : vector<16x128xf32>
      %52 = tpu.matmul %45, %51, %cst_39 {dimension_numbers = #tpu.dot_dimension_numbers<[1], [0], [0], [1], [0, 0, 1, 1], [], []>} : vector<16x32xbf16>, vector<32x128xbf16>, vector<16x128xf32> -> vector<16x128xf32>
      %53 = arith.index_cast %c0_i32_36 : i32 to index
      %c0_40 = arith.constant 0 : index
      %c0_41 = arith.constant 0 : index
      %54 = vector.load %arg10[%53, %c0_40, %c0_41] : memref<1x1x128xf32, #tpu.memory_space<vmem>>, vector<1x1x128xf32>
      %55 = vector.shape_cast %54 : vector<1x1x128xf32> to vector<1x128xf32>
      %56 = vector.broadcast %55 : vector<1x128xf32> to vector<16x128xf32>
      %57 = arith.addf %52, %56 : vector<16x128xf32>
      %cst_42 = arith.constant dense<0xFF800000> : vector<16xf32>
      %58 = vector.multi_reduction <maximumf>, %57, %cst_42 [1] : vector<16x128xf32> to vector<16xf32>
      %59 = vector.shape_cast %58 : vector<16xf32> to vector<16x1xf32>
      %60 = arith.maximumf %47, %59 : vector<16x1xf32>
      %61 = arith.subf %47, %60 : vector<16x1xf32>
      %62 = math.exp %61 : vector<16x1xf32>
      %63 = arith.mulf %48, %62 : vector<16x1xf32>
      %64 = vector.broadcast %60 : vector<16x1xf32> to vector<16x128xf32>
      %65 = arith.subf %57, %64 : vector<16x128xf32>
      %66 = math.exp %65 : vector<16x128xf32>
      %cst_43 = arith.constant dense<0.000000e+00> : vector<16xf32>
      %67 = vector.multi_reduction <add>, %66, %cst_43 [1] : vector<16x128xf32> to vector<16xf32>
      %68 = vector.shape_cast %67 : vector<16xf32> to vector<16x1xf32>
      %69 = arith.addf %63, %68 : vector<16x1xf32>
      %c1_i32 = arith.constant 1 : i32
      %c0_44 = arith.constant 0 : index
      %c0_45 = arith.constant 0 : index
      %70 = vector.load %arg13[%c0_44, %c0_45] : memref<16x1xf32, #tpu.memory_space<vmem>>, vector<16x1xf32>
      tpu.vector_store %arg13[%c0_44, %c0_45], %60 {strides = array<i32>} : memref<16x1xf32, #tpu.memory_space<vmem>>, vector<16x1xf32>,
      %71 = tpu.reciprocal %69 {approx = true} : vector<16x1xf32> -> vector<16x1xf32>
      %72 = arith.mulf %69, %71 : vector<16x1xf32>
      %cst_46 = arith.constant 2.000000e+00 : f32
      %73 = vector.broadcast %cst_46 : f32 to vector<16x1xf32>
      %74 = arith.subf %73, %72 : vector<16x1xf32>
      %75 = arith.mulf %71, %74 : vector<16x1xf32>
      %c0_47 = arith.constant 0 : index
      %c0_48 = arith.constant 0 : index
      %76 = vector.load %arg14[%c0_47, %c0_48] : memref<16x1xf32, #tpu.memory_space<vmem>>, vector<16x1xf32>
      tpu.vector_store %arg14[%c0_47, %c0_48], %75 {strides = array<i32>} : memref<16x1xf32, #tpu.memory_space<vmem>>, vector<16x1xf32>,
    } else {
    }
    %c0 = arith.constant 0 : index
    %c0_1 = arith.constant 0 : index
    %3 = vector.load %arg12[%c0, %c0_1] : memref<16x32xbf16, #tpu.memory_space<vmem>>, vector<16x32xbf16>
    %4 = arith.index_cast %arg1 : i32 to index
    %c0_2 = arith.constant 0 : index
    %c0_3 = arith.constant 0 : index
    %5 = vector.load %arg9[%4, %c0_2, %c0_3] : memref<1x32x128xbf16, #tpu.memory_space<vmem>>, vector<1x32x128xbf16>
    %6 = vector.shape_cast %5 : vector<1x32x128xbf16> to vector<32x128xbf16>
    %cst = arith.constant dense<0.000000e+00> : vector<16x128xf32>
    %7 = tpu.matmul %3, %6, %cst {dimension_numbers = #tpu.dot_dimension_numbers<[1], [0], [0], [1], [0, 0, 1, 1], [], []>} : vector<16x32xbf16>, vector<32x128xbf16>, vector<16x128xf32> -> vector<16x128xf32>
    %8 = arith.index_cast %arg1 : i32 to index
    %c0_4 = arith.constant 0 : index
    %c0_5 = arith.constant 0 : index
    %9 = vector.load %arg10[%8, %c0_4, %c0_5] : memref<1x1x128xf32, #tpu.memory_space<vmem>>, vector<1x1x128xf32>
    %10 = vector.shape_cast %9 : vector<1x1x128xf32> to vector<1x128xf32>
    %11 = vector.broadcast %10 : vector<1x128xf32> to vector<16x128xf32>
    %12 = arith.addf %7, %11 : vector<16x128xf32>
    %c0_6 = arith.constant 0 : index
    %c0_7 = arith.constant 0 : index
    %13 = vector.load %arg13[%c0_6, %c0_7] : memref<16x1xf32, #tpu.memory_space<vmem>>, vector<16x1xf32>
    %14 = vector.broadcast %13 : vector<16x1xf32> to vector<16x128xf32>
    %15 = arith.subf %12, %14 : vector<16x128xf32>
    %16 = math.exp %15 : vector<16x128xf32>
    %c0_8 = arith.constant 0 : index
    %c0_9 = arith.constant 0 : index
    %17 = vector.load %arg14[%c0_8, %c0_9] : memref<16x1xf32, #tpu.memory_space<vmem>>, vector<16x1xf32>
    %18 = vector.broadcast %17 : vector<16x1xf32> to vector<16x128xf32>
    %19 = arith.mulf %16, %18 : vector<16x128xf32>
    %c0_10 = arith.constant 0 : index
    %c0_11 = arith.constant 0 : index
    %20 = vector.load %arg11[%c0_10, %c0_11] : memref<16x128xf32, #tpu.memory_space<vmem>>, vector<16x128xf32>
    tpu.vector_store %arg11[%c0_10, %c0_11], %19 {strides = array<i32>} : memref<16x128xf32, #tpu.memory_space<vmem>>, vector<16x128xf32>,
    return
  }
  func.func @transform_0(%arg0: i32, %arg1: i32) -> (i32, i32) {
    %c0_i32 = arith.constant 0 : i32
    %c0_i32_0 = arith.constant 0 : i32
    return %arg0, %c0_i32 : i32, i32
  }
  func.func @transform_1(%arg0: i32, %arg1: i32) -> (i32, i32) {
    %c0_i32 = arith.constant 0 : i32
    %c0_i32_0 = arith.constant 0 : i32
    %c0_i32_1 = arith.constant 0 : i32
    return %c0_i32, %c0_i32_0 : i32, i32
  }
  func.func @transform_2(%arg0: i32, %arg1: i32) -> (i32, i32) {
    %c0_i32 = arith.constant 0 : i32
    %c0_i32_0 = arith.constant 0 : i32
    %c0_i32_1 = arith.constant 0 : i32
    return %c0_i32, %c0_i32_0 : i32, i32
  }
  func.func @transform_3(%arg0: i32, %arg1: i32) -> (i32, i32) {
    %c0_i32 = arith.constant 0 : i32
    %c0_i32_0 = arith.constant 0 : i32
    %c0_i32_1 = arith.constant 0 : i32
    return %c0_i32, %c0_i32_0 : i32, i32
  }
  func.func @transform_4(%arg0: i32, %arg1: i32) -> (i32, i32) {
    %c0_i32 = arith.constant 0 : i32
    %c0_i32_0 = arith.constant 0 : i32
    %c0_i32_1 = arith.constant 0 : i32
    return %c0_i32, %c0_i32_0 : i32, i32
  }
  func.func @transform_5(%arg0: i32, %arg1: i32) -> (i32, i32) {
    %c0_i32 = arith.constant 0 : i32
    %c0_i32_0 = arith.constant 0 : i32
    %c0_i32_1 = arith.constant 0 : i32
    return %c0_i32, %c0_i32_0 : i32, i32
  }
  func.func @transform_6(%arg0: i32, %arg1: i32) -> (i32, i32) {
    %c0_i32 = arith.constant 0 : i32
    %c0_i32_0 = arith.constant 0 : i32
    %c0_i32_1 = arith.constant 0 : i32
    return %c0_i32, %c0_i32_0 : i32, i32
  }
  func.func @transform_7(%arg0: i32, %arg1: i32) -> (i32, i32, i32) {
    %c0_i32 = arith.constant 0 : i32
    %c0_i32_0 = arith.constant 0 : i32
    %c0_i32_1 = arith.constant 0 : i32
    %c0_i32_2 = arith.constant 0 : i32
    return %c0_i32, %c0_i32_0, %c0_i32_1 : i32, i32, i32
  }
  func.func @transform_8(%arg0: i32, %arg1: i32) -> (i32, i32, i32) {
    %c0_i32 = arith.constant 0 : i32
    %c0_i32_0 = arith.constant 0 : i32
    %c0_i32_1 = arith.constant 0 : i32
    %c0_i32_2 = arith.constant 0 : i32
    return %c0_i32, %c0_i32_0, %c0_i32_1 : i32, i32, i32
  }
  func.func @transform_9(%arg0: i32, %arg1: i32) -> (i32, i32) {
    %c0_i32 = arith.constant 0 : i32
    return %arg0, %arg1 : i32, i32
  }
}

</mosaic_0001>

<bundles_post_ra>
// kernel: tpu_custom_call.1
= control target key start
LH: loop header
LB: loop body
LE: loop exit
PB: predicated region body
PF: predicated region fallthrough
CT: control target
= control target key end

     0   :  { %14 = vsyncpa [#allocation6], 0  ;;  %s868_s0 = inlined_call_operand.vmem [shape: bf16[16,8], index: 0, kind: input, shape index: {}]   ;;  %s869_s1 = inlined_call_operand.hbm [shape: bf16[8,32], index: 1, kind: input, shape index: {}]   ;;  %s870_s2 = inlined_call_operand.vmem [shape: f32[1,32], index: 2, kind: input, shape index: {}]   ;;  %s871_s3 = inlined_call_operand.vmem [shape: bf16[32,32], index: 3, kind: input, shape index: {}]   ;;  %s872_s4 = inlined_call_operand.vmem [shape: f32[1,32], index: 4, kind: input, shape index: {}]   ;;  %s873_s5 = inlined_call_operand.hbm [shape: bf16[32,32], index: 5, kind: input, shape index: {}]   ;;  %s874_s6 = inlined_call_operand.hbm [shape: f32[1,32], index: 6, kind: input, shape index: {}]   ;;  %s875_s7 = inlined_call_operand.vmem [shape: bf16[1,32,128], index: 7, kind: input, shape index: {}]   ;;  %s876_s8 = inlined_call_operand.vmem [shape: f32[1,1,128], index: 8, kind: input, shape index: {}]   ;;  %s877_s9 = inlined_call_operand.hbm [shape: f32[16,128], index: 9, kind: output, shape index: {}]  }
   0x1   :  { %15 = vsyncpa [#allocation9], 0 }
   0x2   :  { %16 = vsyncpa [#allocation7], 0  ;;  %s715_s30 = smov [#allocation8]   ;;  %s621_s13 = scalar_lea.hbm %s873_s5, 256 }
   0x3   :  { %s40_s10 = sshll.u32 %s715_s30, 4  ;;  %p622_p0 = scmp.ne.s32.totalorder %s873_s5, %s621_s13  ;;  %s41_s10 = int_to_ptr.vmem [resolvable:$true] %s40_s10 }
   0x4   :  { %p625_p1 = scmp.lt.u32.totalorder %s621_s13, %s873_s5 }
   0x6   :  { %p627_p2 = pnand %p625_p1, %p622_p0 }
   0x8   :  { %630 = shalt.err (!%p627_p2)
}
   0x9   :  { %s631_s18 = scalar_lea.vmem %s41_s10, 256  ;;  %p636_p4 = scmp.lt.s32.totalorder %s41_s10, %s41_s10 }
   0xa   :  { %p632_p3 = scmp.ne.s32.totalorder %s41_s10, %s631_s18  ;;  %p637_p5 = scmp.lt.s32.totalorder %s631_s18, %s631_s18 }
   0xc   :  { %p638_p6 = por %p637_p5, %p636_p4 }
   0xe   :  { %p639_p7 = pnand %p638_p6, %p632_p3 }
  0x10   :  { %642 = shalt.err (!%p639_p7)
}
  0x11   :  { %s716_s19 = smov 64   ;;  %s717_s20 = smov 4  }
  0x12   :  { %46 = dma.hbm_to_vmem [thread:$0]  %s873_s5, 256, %s41_s10, [#allocation9], %s716_s19, %s716_s19, %s717_s20  }
  0x13   :  { %s718_s23 = smov [#allocation5]   ;;  %s719_s25 = smov [#allocation10]  }
  0x14   :  { %s25_s24 = sshll.u32 %s718_s23, 4  ;;  %s53_s26 = sshll.u32 %s719_s25, 4  ;;  %s26_s24 = int_to_ptr.vmem [resolvable:$true] %s25_s24  ;;  %s54_s26 = int_to_ptr.vmem [resolvable:$true] %s53_s26 }
  0x15   :  { %s643_s29 = scalar_lea.hbm %s869_s1, 64 }
  0x16   :  { %p644_p8 = scmp.ne.s32.totalorder %s869_s1, %s643_s29  ;;  %p647_p9 = scmp.lt.u32.totalorder %s643_s29, %s869_s1 }
  0x18   :  { %p649_p10 = pnand %p647_p9, %p644_p8 }
  0x1a   :  { %652 = shalt.err (!%p649_p10)
}
  0x1b   :  { %s653_s5 = scalar_lea.vmem %s26_s24, 64  ;;  %p658_p12 = scmp.lt.s32.totalorder %s26_s24, %s26_s24 }
  0x1c   :  { %p654_p11 = scmp.ne.s32.totalorder %s26_s24, %s653_s5  ;;  %p659_p13 = scmp.lt.s32.totalorder %s653_s5, %s653_s5 }
  0x1e   :  { %p660_p0 = por %p659_p13, %p658_p12 }
  0x20   :  { %p661_p1 = pnand %p660_p0, %p654_p11 }
  0x22   :  { %664 = shalt.err (!%p661_p1)
}
  0x23   :  { %28 = dma.hbm_to_vmem [thread:$0]  %s869_s1, 64, %s26_s24, [#allocation6]  }
  0x24   :  { %s665_s17 = scalar_lea.hbm %s874_s6, 16 }
  0x25   :  { %p666_p2 = scmp.ne.s32.totalorder %s874_s6, %s665_s17  ;;  %p669_p3 = scmp.lt.u32.totalorder %s665_s17, %s874_s6 }
  0x27   :  { %p671_p4 = pnand %p669_p3, %p666_p2 }
  0x29   :  { %674 = shalt.err (!%p671_p4)
}
  0x2a   :  { %s675_s22 = scalar_lea.vmem %s54_s26, 16  ;;  %s679_s23 = scalar_lea.vmem %s54_s26, 32 }
  0x2b   :  { %p676_p5 = scmp.ne.s32.totalorder %s54_s26, %s675_s22  ;;  %p680_p6 = scmp.lt.s32.totalorder %s54_s26, %s54_s26 }
  0x2c   :  { %p681_p7 = scmp.lt.s32.totalorder %s679_s23, %s675_s22 }
  0x2e   :  { %p682_p8 = por %p681_p7, %p680_p6 }
  0x30   :  { %p683_p9 = pnand %p682_p8, %p676_p5 }
  0x32   :  { %686 = shalt.err (!%p683_p9)
}
  0x33   :  { %56 = dma.hbm_to_vmem [thread:$0]  %s874_s6, 16, %s54_s26, [#allocation9]  }
  0x34   :  { %709 = dma.done.wait [#allocation6], 64  }
  0x35   :  { %710 = vsyncadd [#allocation6], 4294967232 }
  0x36   :  { %711 = dma.done.wait [#allocation9], 272  }
  0x37   :  { %712 = vsyncadd [#allocation9], 4294967024  ;;  %v720_v0 = vmov 0.0   ;;  %vm721_vm0 = vmmov 0   ;;  %vm94_vm1 = vcmask 1043456   ;;  %v596_v3 = vld [vmem:[%s868_s0] sm:$0xff]  }
  0x38   :  { %545 = vmatprep.subr.bf16.mxu0 %v720_v0  ;;  %547 = vmatprep.mubr.msk.bf16.mxu0 %vm721_vm0, %v720_v0  ;;  %v77_v1 = vld [vmem:[#allocation5] sm:$0xf]  ;;  %vm90_vm2 = vcmask 64512   ;;  %v597_v4 = vld [vmem:[%s871_s3] sm:$0xff]   ;;  %v598_v5 = vld [vmem:[%s871_s3 + $0x8] sm:$0xff]   ;;  %vm165_vm3 = vcmask 261120  }
  0x39   :  { %551 = vmatprep.subr.bf16.mxu1 %v720_v0  ;;  %555 = vmatprep.mubr.msk.bf16.mxu1 %vm721_vm0, %v720_v0  ;;  %v96_v2 = vsel %vm94_vm1, %v77_v1, 0  ;;  %v512_v6 = vld [vmem:[%s870_s2] ss:$0 sm:$0xff]  ;;  %v599_v16 = vld [vmem:[#allocation8] sm:$0xff]   ;;  %v602_v29 = vld [vmem:[%s875_s7 + $0x8] sm:$0xff]   ;;  %v722_v56 = vmov 0  }
  0x3a   :  { %546 = vmatpush3.bf16.msra.mxu0 %v96_v2  ;;  %552 = vmatpush3.bf16.msra.mxu1 %v597_v4  ;;  %v600_v17 = vld [vmem:[#allocation8 + $0x8] sm:$0xff]   ;;  %v604_v31 = vld [vmem:[%s875_s7 + $0x8] sm:$0xff]   ;;  %v519_v32 = vld [vmem:[#allocation10] ss:$0 sm:$0xff]  ;;  %vm375_vm4 = vcmask 7168  }
  0x3b   :  { %559 = vmatprep.subr.bf16.mxu0 %v720_v0  ;;  %553 = vmatprep.subr.bf16.mxu1 %v720_v0  ;;  %v515_v18 = vld [vmem:[%s872_s4] ss:$0 sm:$0xff] }
  0x3c   :  { %v601_v28 = vld [vmem:[%s875_s7] sm:$0xff]   ;;  %594 = vset.pattern.permute.xlu0 %v722_v56  ;;  %595 = vset.pattern.permute.xlu1 %v722_v56 }
  0x3d   :  { %548 = vmatmul.mubr.msk.bf16.vlgmr.msra.gmra.mrb[0].mxu0 %vm90_vm2, %v596_v3  ;;  %v603_v30 = vld [vmem:[%s875_s7] sm:$0xff]  }
  0x3e   :  { %563 = vmatprep.mubr.msk.bf16.mxu0 %vm721_vm0, %v720_v0  ;;  %554 = vmatpush3.bf16.msra.mxu1 %v598_v5  ;;  %v523_v43 = vld [vmem:[%s876_s8] ss:$0 sm:$0xff]  ;;  %s723_s8 = smov [#allocation11]  }
  0x3f   :  { %567 = vmatprep.subr.bf16.mxu1 %v720_v0  ;;  %560 = vmatpush3.bf16.msra.mxu0 %v599_v16  ;;  %s499_s17 = sshll.u32 %s723_s8, 4  ;;  %s500_s17 = int_to_ptr.vmem [resolvable:$true] %s499_s17 }
  0x40   :  { %561 = vmatprep.subr.bf16.mxu0 %v720_v0  ;;  %s687_s18 = scalar_lea.vmem %s500_s17, 256  ;;  %p692_p11 = scmp.lt.s32.totalorder %s500_s17, %s500_s17 }
  0x41   :  { %p688_p10 = scmp.ne.s32.totalorder %s500_s17, %s687_s18  ;;  %p693_p12 = scmp.lt.s32.totalorder %s687_s18, %s687_s18 }
  0x43   :  { %562 = vmatpush3.bf16.msra.mxu0 %v600_v17  ;;  %p694_p13 = por %p693_p12, %p692_p11 }
  0x44   :  { %575 = vmatprep.subr.bf16.mxu0 %v720_v0 }
  0x45   :  { %p695_p0 = pnand %p694_p13, %p688_p10 }
 0x110   :  { %v132_v7 = vpop.f32.mrb[0].mxu0 }
 0x111   :  { %v133_v8 = vadd.f32 %v512_v6, %v132_v7  ;;  %v549_v9 = vpop.f32.mrb[1].mxu0 }
 0x112   :  { %v135_v10 = vpop.f32.mrb[2].mxu0 }
 0x113   :  { %v136_v11 = vadd.f32 %v512_v6, %v135_v10  ;;  %v550_v12 = vpop.f32.mrb[3].mxu0  ;;  %v139_v13 = vmax.f32 %v133_v8, 0.0 }
 0x115   :  { %v140_v14 = vmax.f32 %v136_v11, 0.0 }
 0x117   :  { %v141_v15 = vpack.c.bf16 %v140_v14, %v139_v13 }
 0x119   :  { %556 = vmatmul.mubr.msk.bf16.vlgmr.msra.gmra.mrb[0].mxu1 %vm165_vm3, %v141_v15 }
 0x11a   :  { %571 = vmatprep.mubr.msk.bf16.mxu1 %vm721_vm0, %v720_v0  ;;  %568 = vmatpush3.bf16.msra.mxu1 %v601_v28 }
 0x11b   :  { %569 = vmatprep.subr.bf16.mxu1 %v720_v0 }
 0x11e   :  { %570 = vmatpush3.bf16.msra.mxu1 %v602_v29 }
 0x1ec   :  { %v203_v19 = vpop.f32.mrb[0].mxu1 }
 0x1ed   :  { %v204_v20 = vadd.f32 %v515_v18, %v203_v19  ;;  %v557_v21 = vpop.f32.mrb[1].mxu1 }
 0x1ee   :  { %v206_v22 = vpop.f32.mrb[2].mxu1 }
 0x1ef   :  { %v207_v23 = vadd.f32 %v515_v18, %v206_v22  ;;  %v558_v24 = vpop.f32.mrb[3].mxu1  ;;  %v210_v25 = vmax.f32 %v204_v20, 0.0 }
 0x1f1   :  { %v211_v26 = vmax.f32 %v207_v23, 0.0 }
 0x1f3   :  { %v212_v27 = vpack.c.bf16 %v211_v26, %v210_v25 }
 0x1f5   :  { %564 = vmatmul.mubr.msk.bf16.vlgmr.msra.gmra.mrb[4].mxu0 %vm165_vm3, %v212_v27 }
 0x1f6   :  { %579 = vmatprep.mubr.msk.bf16.mxu0 %vm721_vm0, %v720_v0  ;;  %576 = vmatpush3.bf16.msra.mxu0 %v603_v30 }
 0x1f7   :  { %577 = vmatprep.subr.bf16.mxu0 %v720_v0 }
 0x1fa   :  { %578 = vmatpush3.bf16.msra.mxu0 %v604_v31 }
 0x2c8   :  { %v273_v33 = vpop.f32.mrb[4].mxu0 }
 0x2c9   :  { %v274_v34 = vadd.f32 %v519_v32, %v273_v33  ;;  %v565_v35 = vpop.f32.mrb[5].mxu0 }
 0x2ca   :  { %v276_v36 = vpop.f32.mrb[6].mxu0 }
 0x2cb   :  { %v277_v37 = vadd.f32 %v519_v32, %v276_v36  ;;  %v566_v38 = vpop.f32.mrb[7].mxu0  ;;  %v280_v39 = vmax.f32 %v274_v34, 0.0 }
 0x2cd   :  { %v281_v40 = vmax.f32 %v277_v37, 0.0 }
 0x2cf   :  { %v282_v41 = vpack.c.bf16 %v281_v40, %v280_v39 }
 0x2d1   :  { %283 = vst.msk [vmem:[#allocation2] sm:$0xff] %vm165_vm3, %v282_v41  ;;  %572 = vmatmul.mubr.msk.bf16.vlgmr.msra.gmra.mrb[4].mxu1 %vm165_vm3, %v282_v41 }
 0x2d8   :  { %v388_v42 = vld [vmem:[#allocation2] sm:$0xff] }
 0x2d9   :  { %580 = vmatmul.mubr.msk.bf16.vlgmr.msra.gmra.mrb[8].mxu0 %vm165_vm3, %v388_v42 }
 0x3a4   :  { %v344_v44 = vpop.f32.mrb[4].mxu1 }
 0x3a5   :  { %v345_v45 = vadd.f32 %v523_v43, %v344_v44  ;;  %v573_v46 = vpop.f32.mrb[5].mxu1 }
 0x3a6   :  { %v347_v47 = vpop.f32.mrb[6].mxu1 }
 0x3a7   :  { %351 = vmax.xlane.f32.xlu0 %v345_v45  ;;  %v574_v48 = vpop.f32.mrb[7].mxu1  ;;  %v348_v49 = vadd.f32 %v523_v43, %v347_v47 }
 0x3ab   :  { %353 = vmax.xlane.f32.xlu0 %v348_v49 }
 0x3ac   :  { %v453_v50 = vpop.f32.mrb[8].mxu0 }
 0x3ad   :  { %v454_v51 = vadd.f32 %v523_v43, %v453_v50  ;;  %v581_v52 = vpop.f32.mrb[9].mxu0 }
 0x3ae   :  { %v456_v53 = vpop.f32.mrb[10].mxu0 }
 0x3af   :  { %v457_v54 = vadd.f32 %v523_v43, %v456_v53  ;;  %v582_v55 = vpop.f32.mrb[11].mxu0 }
 0x434   :  { %v352_v57 = vpop.xlane.xlu0 %351 }
 0x435   :  { %376 = vst.msk [vmem:[#allocation3] sm:$0xff] %vm375_vm4, %v352_v57  ;;  %v363_v58 = vsub.f32 %v345_v45, %v352_v57  ;;  %v355_v3 = vsub.f32 -inf, %v352_v57 }
 0x437   :  { %v365_v59 = vmul.f32 1.442695, %v363_v58  ;;  %v357_v4 = vmul.f32 1.442695, %v355_v3 }
 0x438   :  { %v354_v60 = vpop.xlane.xlu0 %353 }
 0x439   :  { %v364_v61 = vsub.f32 %v348_v49, %v354_v60  ;;  %377 = vst.msk [vmem:[#allocation3 + $0x8] sm:$0xff] %vm375_vm4, %v354_v60  ;;  %605 = vpow2.f32 %v365_v59  ;;  %v356_v5 = vsub.f32 -inf, %v354_v60 }
 0x43b   :  { %v367_v62 = vmul.f32 1.442695, %v364_v61  ;;  %v359_v6 = vmul.f32 1.442695, %v356_v5 }
 0x43c   :  { %v460_v63 = vld [vmem:[#allocation3] sm:$0xff] }
 0x43d   :  { %464 = vperm.xlu0 %594, %v460_v63   ;;  %607 = vpow2.f32 %v367_v62 }
 0x43e   :  { %609 = vpow2.f32 %v357_v4 }
 0x43f   :  { %611 = vpow2.f32 %v359_v6 }
 0x440   :  { %v461_v2 = vld [vmem:[#allocation3 + $0x8] sm:$0xff] }
 0x443   :  { %v606_v0 = vpop.eup %605 }
 0x444   :  { %369 = vadd.xlane.f32.xlu1 %v606_v0 }
 0x447   :  { %v608_v1 = vpop.eup %607 }
 0x448   :  { %371 = vadd.xlane.f32.xlu1 %v608_v1  ;;  %v610_v7 = vpop.eup %609 }
 0x449   :  { %v361_v8 = vmul.f32 0.0, %v610_v7  ;;  %v612_v9 = vpop.eup %611 }
 0x44a   :  { %v362_v12 = vmul.f32 0.0, %v612_v9 }
 0x459   :  { %469 = vperm.xlu1 %595, %v461_v2  }
 0x4bc   :  { %v465_v25 = vpop.permute.xlu0 %464 }
 0x4bd   :  { %v472_v26 = vsub.f32 %v454_v51, %v465_v25 }
 0x4bf   :  { %v474_v28 = vmul.f32 1.442695, %v472_v26 }
 0x4d1   :  { %v370_v10 = vpop.xlane.xlu1 %369 }
 0x4d2   :  { %v373_v11 = vadd.f32 %v370_v10, %v361_v8 }
 0x4d4   :  { %613 = vrcp.f32 %v373_v11 }
 0x4d5   :  { %v372_v13 = vpop.xlane.xlu1 %371 }
 0x4d6   :  { %v374_v14 = vadd.f32 %v372_v13, %v362_v12 }
 0x4d8   :  { %615 = vrcp.f32 %v374_v14 }
 0x4d9   :  { %v470_v27 = vpop.permute.xlu1 %469  ;;  %617 = vpow2.f32 %v474_v28 }
 0x4da   :  { %v473_v29 = vsub.f32 %v457_v54, %v470_v27 }
 0x4dc   :  { %v476_v30 = vmul.f32 1.442695, %v473_v29 }
 0x4de   :  { %v614_v15 = vpop.eup %613  ;;  %619 = vpow2.f32 %v476_v30 }
 0x4df   :  { %v380_v16 = vmul.f32 %v614_v15, %v373_v11 }
 0x4e1   :  { %v382_v17 = vsub.f32 2.0, %v380_v16 }
 0x4e2   :  { %v616_v18 = vpop.eup %615 }
 0x4e3   :  { %v384_v19 = vmul.f32 %v614_v15, %v382_v17  ;;  %v381_v20 = vmul.f32 %v616_v18, %v374_v14  ;;  %v618_v31 = vpop.eup %617 }
 0x4e5   :  { %386 = vst.msk [vmem:[#allocation4] sm:$0xff] %vm375_vm4, %v384_v19  ;;  %v383_v21 = vsub.f32 2.0, %v381_v20 }
 0x4e7   :  { %v385_v22 = vmul.f32 %v616_v18, %v383_v21 }
 0x4e8   :  { %v620_v34 = vpop.eup %619 }
 0x4e9   :  { %387 = vst.msk [vmem:[#allocation4 + $0x8] sm:$0xff] %vm375_vm4, %v385_v22 }
 0x4ec   :  { %v478_v23 = vld [vmem:[#allocation4] sm:$0xff] }
 0x4ed   :  { %482 = vperm.xlu1 %595, %v478_v23  }
 0x4f0   :  { %v479_v24 = vld [vmem:[#allocation4 + $0x8] sm:$0xff] }
 0x4f1   :  { %487 = vperm.xlu1 %595, %v479_v24  }
 0x56c   :  { %v483_v32 = vpop.permute.xlu1 %482 }
 0x56d   :  { %v490_v33 = vmul.f32 %v618_v31, %v483_v32 }
 0x56f   :  { %492 = vst [vmem:[#allocation11] sm:$0xff] %v490_v33 }
 0x570   :  { %v488_v35 = vpop.permute.xlu1 %487 }
 0x571   :  { %v491_v36 = vmul.f32 %v620_v34, %v488_v35 }
 0x573   :  { %493 = vst [vmem:[#allocation11 + $0x8] sm:$0xff] %v491_v36 }
 0x574   :  { %698 = shalt.err (!%p695_p0)
}
 0x575   :  { %s699_s21 = scalar_lea.hbm %s877_s9, 256 }
 0x576   :  { %p700_p1 = scmp.ne.s32.totalorder %s877_s9, %s699_s21  ;;  %p703_p2 = scmp.lt.u32.totalorder %s699_s21, %s877_s9 }
 0x578   :  { %p705_p3 = pnand %p703_p2, %p700_p1 }
 0x57a   :  { %708 = shalt.err (!%p705_p3)
}
 0x57b   :  { %s724_s25 = smov 128   ;;  %s725_s27 = smov 8  }
 0x57c   :  { %505 = dma.vmem_to_hbm [thread:$0]  %s500_s17, 256, %s877_s9, [#allocation7], %s724_s25, %s724_s25, %s725_s27  }
 0x57d   :  { %713 = dma.done.wait [#allocation7], 256  }
 0x57e   :  { %714 = vsyncadd [#allocation7], 4294967040 }
 0x57f   :  { %509 = vsyncpa [#allocation6], 1 }
 0x580   :  { %510 = vsyncpa [#allocation9], 1 }
 0x581   :  { %511 = vsyncpa [#allocation7], 1 }

</bundles_post_ra>
